<compile_context>
chip_gen: v5e
topology: v5e:2x2
jax: 0.10.0
libtpu: 0.0.40
codegen_flags: <defaults>
</compile_context>

<pallas_src>
import functools
import math

import jax
import jax.numpy as jnp
from jax.experimental import pallas as pl
from jax.experimental.pallas import tpu as pltpu

_INV_SQRT2 = 1.0 / math.sqrt(2.0)
_MIB = 1024 * 1024


def _round_up(x, m):
    return (x + m - 1) // m * m


# ----------------------------------------------------------------------------
# Capability probes (resolved once, outside jit).
# ----------------------------------------------------------------------------
def _probe_copy_kernel(x_ref, o_ref):
    o_ref[...] = x_ref[...]


def _probe_buffered_support():
    """Compile a tiny kernel to check BlockSpec(pipeline_mode=pl.Buffered(1))
    is supported, so constant-index weight blocks can be single-buffered.
    Falls back to the default double-buffering if anything fails."""
    try:
        spec = pl.BlockSpec((8, 128), lambda i: (0, 0),
                            pipeline_mode=pl.Buffered(1))
        fn = pl.pallas_call(
            _probe_copy_kernel,
            out_shape=jax.ShapeDtypeStruct((8, 128), jnp.float32),
            grid=(1,),
            in_specs=[spec],
            out_specs=pl.BlockSpec((8, 128), lambda i: (0, 0)),
        )
        jax.jit(fn).lower(jnp.zeros((8, 128), jnp.float32)).compile()
        return True
    except Exception:
        return False


_HAS_BUFFERED_1 = _probe_buffered_support()


def _physical_vmem_bytes():
    try:
        return int(pltpu.get_tpu_info().vmem_capacity_bytes)
    except Exception:
        return 64 * _MIB  # conservative default (v7x-sized)


def _spec(block_shape, index_map, buffers=None):
    """BlockSpec helper; requests an explicit buffer count when supported."""
    if buffers is not None and _HAS_BUFFERED_1:
        return pl.BlockSpec(block_shape, index_map,
                            pipeline_mode=pl.Buffered(buffers))
    return pl.BlockSpec(block_shape, index_map)


def _pick_spatial_tile(hw, batch, tile_hw):
    """Choose a lane-dense spatial tile.

    Preference order:
      1. hw % 128 == 0 : largest multiple of 128 that divides hw (<= tile_hw)
                         -> no pad, no post-slice (16x16 / 32x32 / 64x64 maps)
      2. hw <= tile_hw : full-extent block -> no pad, no post-slice
      3. otherwise     : tile_hw rounded to 128, with spatial padding
    Also tries to guarantee >= 2 grid steps so both v7x TensorCores get work.
    """
    tile_hw = max(128, int(tile_hw))
    if hw % 128 == 0:
        tile = 128
        t = 256
        while t <= min(hw, tile_hw):
            if hw % t == 0:
                tile = t
            t += 128
        hw_pad = hw
    elif hw <= tile_hw:
        tile, hw_pad = hw, hw          # full-extent block (no 128 constraint)
    else:
        tile = _round_up(tile_hw, 128)
        hw_pad = _round_up(hw, tile)
    # v7x megacore: prefer >= 2 parallel grid steps.
    if batch * (hw_pad // tile) < 2 and tile >= 256:
        half = tile // 2
        if half % 128 == 0 and hw_pad % half == 0:
            tile = half
    return tile, hw_pad


# ----------------------------------------------------------------------------
# Kernel
# ----------------------------------------------------------------------------
def _ffn_kernel(x_ref, w1_ref, b1_ref, w2_ref, b2_ref, o_ref, *,
                n_chunks, chunk, exact_gelu):
    # x_ref : (dim, tile_hw)   activation slab, spatial axis on lanes (bf16)
    # w1_ref: (d_ff_pad, dim)  project_in weight  (MXU dtype)
    # b1_ref: (d_ff_pad, 1)    f32 bias (broadcast across lanes)
    # w2_ref: (dim, d_ff_pad)  project_out weight (MXU dtype)
    # b2_ref: (dim, 1)         f32 bias
    # o_ref : (dim, tile_hw)   lane-dense output tile
    x = x_ref[...]
    acc = None
    # Static unroll over d_ff chunks: bounds the f32 intermediate in VMEM.
    for c in range(n_chunks):
        rows = pl.ds(c * chunk, chunk)
        h = jnp.dot(w1_ref[rows, :], x, preferred_element_type=jnp.float32)
        h = h + b1_ref[rows, :]
        if exact_gelu:
            # Exact erf GELU (torch.nn.functional.gelu default). Note: erf
            # expands to a VALU polynomial; exact_gelu=False uses tanh on the
            # EUP slot instead (overlaps with MXU, slightly different math).
            h = 0.5 * h * (1.0 + jax.lax.erf(h * _INV_SQRT2))
        else:
            h = jax.nn.gelu(h, approximate=True)
        part = jnp.dot(w2_ref[:, rows], h.astype(w2_ref.dtype),
                       preferred_element_type=jnp.float32)
        acc = part if acc is None else acc + part
    o_ref[...] = (acc + b2_ref[...]).astype(o_ref.dtype)


# ----------------------------------------------------------------------------
# Wrapper
# ----------------------------------------------------------------------------
@functools.partial(jax.jit,
                   static_argnames=("tile_hw", "mxu_dtype", "exact_gelu"))
def feed_forward(x, w1, b1, w2, b2, *, tile_hw=1024, mxu_dtype=jnp.bfloat16,
                 exact_gelu=True):
    """Fused 1x1-conv FFN: y = W2 @ gelu(W1 @ x + b1) + b2, NCHW layout.

    x : (B, dim, H, W);  w1: (d_ff, dim, 1, 1);  b1: (d_ff,);
    w2: (dim, d_ff, 1, 1);  b2: (dim,).  Returns (B, dim, H, W) in x.dtype.

    MXU operands (x, W1, W2) are cast to `mxu_dtype` (bf16 by default, ~3x
    MXU throughput and half the activation HBM traffic); bias add,
    accumulation and GELU stay in f32.  Pass mxu_dtype=None to keep x.dtype.
    """
    b, c, sh, sw = x.shape
    d_ff = w1.shape[0]
    dim = w2.shape[0]
    assert c == dim and w1.shape[1] == dim and w2.shape[1] == d_ff

    compute_dtype = jnp.dtype(x.dtype if mxu_dtype is None else mxu_dtype)
    out_dtype = x.dtype

    hw = sh * sw
    tile, hw_pad = _pick_spatial_tile(hw, b, tile_hw)

    # d_ff alignment + chunking: bound the f32 intermediate (chunk, tile) so
    # large d_ff cannot blow VMEM (matters on v7x's 64 MiB).
    granule = 16 if compute_dtype.itemsize < 4 else 8
    d_ff_pad = _round_up(d_ff, granule)
    h_budget = 8 * _MIB
    max_chunk = max(granule, (h_budget // (tile * 4)) // granule * granule)
    if d_ff_pad <= max_chunk:
        chunk, n_chunks = d_ff_pad, 1
    else:
        chunk = max_chunk
        n_chunks = (d_ff_pad + chunk - 1) // chunk
        d_ff_pad = n_chunks * chunk

    # NCHW -> (B, dim, H*W): pure reshape (contiguous), no transpose.
    # NOTE: `dim` is deliberately left unpadded — it is the full extent of
    # its axis everywhere, so no layout constraint forces padding, and
    # padding channels would multiply activation HBM traffic.
    x_flat = x.reshape(b, dim, hw).astype(compute_dtype)
    if hw_pad != hw:
        x_flat = jnp.pad(x_flat, ((0, 0), (0, 0), (0, hw_pad - hw)))

    w1_2d = w1.reshape(d_ff, dim).astype(compute_dtype)
    w2_2d = w2.reshape(dim, d_ff).astype(compute_dtype)
    b1_col = b1.reshape(d_ff, 1).astype(jnp.float32)
    b2_col = b2.reshape(dim, 1).astype(jnp.float32)
    if d_ff_pad != d_ff:
        # Zero padding is exact: gelu(0 + 0) = 0 and padded W2 columns are 0.
        w1_2d = jnp.pad(w1_2d, ((0, d_ff_pad - d_ff), (0, 0)))
        w2_2d = jnp.pad(w2_2d, ((0, 0), (0, d_ff_pad - d_ff)))
        b1_col = jnp.pad(b1_col, ((0, d_ff_pad - d_ff), (0, 0)))

    # VMEM budget: double-buffered activation tiles, weights single-buffered
    # when supported, f32 intermediate chunk + partial, 2x safety margin,
    # capped at 75% of this chip's physical VMEM (v5e/v6e 128 MiB, v7x 64).
    c_sz = compute_dtype.itemsize
    o_sz = jnp.dtype(out_dtype).itemsize
    w_bufs = 1 if _HAS_BUFFERED_1 else 2
    est = (2 * dim * tile * c_sz                    # x tile, double-buffered
           + 2 * dim * tile * o_sz                  # out tile, double-buffered
           + w_bufs * 2 * d_ff_pad * dim * c_sz     # W1 + W2 (resident)
           + w_bufs * (d_ff_pad + dim) * 128 * 4    # biases, lane-padded
           + (chunk + dim) * tile * 4)              # f32 h chunk + f32 partial
    vmem_cap = int(0.75 * _physical_vmem_bytes())
    vmem_limit = int(min(max(2 * est, 16 * _MIB), vmem_cap))

    kernel = functools.partial(_ffn_kernel, n_chunks=n_chunks, chunk=chunk,
                               exact_gelu=exact_gelu)

    cost = pl.CostEstimate(
        flops=4 * b * hw_pad * dim * d_ff_pad,          # two matmuls
        transcendentals=b * hw_pad * d_ff_pad,          # one erf/tanh per h
        bytes_accessed=(b * dim * hw_pad * c_sz         # x
                        + b * dim * hw_pad * o_sz       # out
                        + 2 * d_ff_pad * dim * c_sz     # weights
                        + (d_ff_pad + dim) * 4),        # biases
    )

    grid = (b, hw_pad // tile)
    out_flat = pl.pallas_call(
        kernel,
        out_shape=jax.ShapeDtypeStruct((b, dim, hw_pad), out_dtype),
        grid_spec=pltpu.PrefetchScalarGridSpec(
            num_scalar_prefetch=0,
            grid=grid,
            in_specs=[
                _spec((None, dim, tile), lambda bi, j: (bi, 0, j)),      # x
                _spec((d_ff_pad, dim), lambda bi, j: (0, 0), buffers=1),  # W1
                _spec((d_ff_pad, 1), lambda bi, j: (0, 0), buffers=1),    # b1
                _spec((dim, d_ff_pad), lambda bi, j: (0, 0), buffers=1),  # W2
                _spec((dim, 1), lambda bi, j: (0, 0), buffers=1),         # b2
            ],
            out_specs=_spec((None, dim, tile), lambda bi, j: (bi, 0, j)),
        ),
        compiler_params=pltpu.CompilerParams(
            dimension_semantics=("parallel", "parallel"),
            vmem_limit_bytes=vmem_limit,
        ),
        cost_estimate=cost,
    )(x_flat, w1_2d, b1_col, w2_2d, b2_col)

    if hw_pad != hw:
        out_flat = out_flat[:, :, :hw]
    return out_flat.reshape(b, dim, sh, sw)


# ----------------------------------------------------------------------------
# References
# ----------------------------------------------------------------------------
def _reference_f32(x, w1, b1, w2, b2):
    """Pure-f32 JAX equivalent of Conv2d(1x1) -> GELU(exact) -> Conv2d(1x1)."""
    w1_2d = w1.reshape(w1.shape[0], w1.shape[1]).astype(jnp.float32)
    w2_2d = w2.reshape(w2.shape[0], w2.shape[1]).astype(jnp.float32)
    h = jnp.einsum("bchw,fc->bfhw", x.astype(jnp.float32), w1_2d)
    h = h + b1.astype(jnp.float32)[None, :, None, None]
    h = 0.5 * h * (1.0 + jax.lax.erf(h * _INV_SQRT2))
    y = jnp.einsum("bfhw,cf->bchw", h, w2_2d)
    return y + b2.astype(jnp.float32)[None, :, None, None]


def _reference_mixed(x, w1, b1, w2, b2, compute_dtype):
    """Mirrors the kernel's dtype policy: MXU operands in compute_dtype,
    f32 accumulation / bias / GELU."""
    cd = jnp.dtype(compute_dtype)
    w1_2d = w1.reshape(w1.shape[0], w1.shape[1]).astype(cd)
    w2_2d = w2.reshape(w2.shape[0], w2.shape[1]).astype(cd)
    h = jnp.einsum("bchw,fc->bfhw", x.astype(cd), w1_2d,
                   preferred_element_type=jnp.float32)
    h = h + b1.astype(jnp.float32)[None, :, None, None]
    h = 0.5 * h * (1.0 + jax.lax.erf(h * _INV_SQRT2))
    y = jnp.einsum("bfhw,cf->bchw", h.astype(cd), w2_2d,
                   preferred_element_type=jnp.float32)
    y = y + b2.astype(jnp.float32)[None, :, None, None]
    return y.astype(x.dtype)


if __name__ == "__main__":
    key = jax.random.PRNGKey(0)
    B, DIM, H, W = 2, 8, 16, 16
    D_FF = 32

    k_x, k_w1, k_b1, k_w2, k_b2 = jax.random.split(key, 5)
    x = jax.random.normal(k_x, (B, DIM, H, W), dtype=jnp.float32)
    # Synthetic parameters with nn.Conv2d(kernel_size=1) shapes.
    w1 = jax.random.normal(k_w1, (D_FF, DIM, 1, 1), dtype=jnp.float32) * 0.1
    b1 = jax.random.normal(k_b1, (D_FF,), dtype=jnp.float32) * 0.1
    w2 = jax.random.normal(k_w2, (DIM, D_FF, 1, 1), dtype=jnp.float32) * 0.1
    b2 = jax.random.normal(k_b2, (DIM,), dtype=jnp.float32) * 0.1

    out = feed_forward(x, w1, b1, w2, b2)
    out = jax.block_until_ready(out)
    assert out.shape == (B, DIM, H, W)

    # Tight check against a reference that mirrors the kernel's dtype policy.
    ref_mixed = _reference_mixed(x, w1, b1, w2, b2, jnp.bfloat16)
    err_mixed = float(jnp.max(jnp.abs(out - ref_mixed)))
    assert jnp.allclose(out, ref_mixed, atol=2e-3, rtol=2e-3), err_mixed

    # Loose sanity check against the pure-f32 (torch-equivalent) math.
    ref_f32 = _reference_f32(x, w1, b1, w2, b2)
    err_f32 = float(jnp.max(jnp.abs(out - ref_f32)))
    assert jnp.allclose(out, ref_f32, atol=5e-2, rtol=5e-2), err_f32

    print("KERNEL_OK")
</pallas_src>

<mosaic_0001>
module attributes {stable_mosaic.version = 11 : i64} {
  func.func @_ffn_kernel(%arg0: i32, %arg1: i32, %arg2: memref<1x8x256xbf16, #tpu.memory_space<vmem>>, %arg3: memref<32x8xbf16, #tpu.memory_space<vmem>>, %arg4: memref<32x1xf32, #tpu.memory_space<vmem>>, %arg5: memref<8x32xbf16, #tpu.memory_space<vmem>>, %arg6: memref<8x1xf32, #tpu.memory_space<vmem>>, %arg7: memref<1x8x256xf32, #tpu.memory_space<vmem>>) attributes {dimension_semantics = [#tpu.dimension_semantics<parallel>, #tpu.dimension_semantics<parallel>], iteration_bounds = array<i64: 2, 1>, scalar_prefetch = 0 : i64, scratch_operands = 0 : i64, tpu.core_type = #tpu.core_type<tc>, window_params = [{transform_indices = @transform_0, window_bounds = array<i64: 1, 8, 256>}, {pipeline_mode = #tpu.pipeline_mode<synchronous>, transform_indices = @transform_1, window_bounds = array<i64: 32, 8>}, {pipeline_mode = #tpu.pipeline_mode<synchronous>, transform_indices = @transform_2, window_bounds = array<i64: 32, 1>}, {pipeline_mode = #tpu.pipeline_mode<synchronous>, transform_indices = @transform_3, window_bounds = array<i64: 8, 32>}, {pipeline_mode = #tpu.pipeline_mode<synchronous>, transform_indices = @transform_4, window_bounds = array<i64: 8, 1>}, {transform_indices = @transform_5, window_bounds = array<i64: 1, 8, 256>}]} {
    %c0 = arith.constant 0 : index
    %c0_0 = arith.constant 0 : index
    %c0_1 = arith.constant 0 : index
    %0 = vector.load %arg2[%c0, %c0_0, %c0_1] : memref<1x8x256xbf16, #tpu.memory_space<vmem>>, vector<1x8x256xbf16>
    %1 = vector.shape_cast %0 : vector<1x8x256xbf16> to vector<8x256xbf16>
    %c0_2 = arith.constant 0 : index
    %c0_3 = arith.constant 0 : index
    %2 = vector.load %arg3[%c0_2, %c0_3] : memref<32x8xbf16, #tpu.memory_space<vmem>>, vector<32x8xbf16>
    %cst = arith.constant dense<0.000000e+00> : vector<32x256xf32>
    %3 = tpu.matmul %2, %1, %cst {dimension_numbers = #tpu.dot_dimension_numbers<[1], [0], [0], [1], [0, 0, 1, 1], [], []>} : vector<32x8xbf16>, vector<8x256xbf16>, vector<32x256xf32> -> vector<32x256xf32>
    %c0_4 = arith.constant 0 : index
    %c0_5 = arith.constant 0 : index
    %4 = vector.load %arg4[%c0_4, %c0_5] : memref<32x1xf32, #tpu.memory_space<vmem>>, vector<32x1xf32>
    %5 = vector.broadcast %4 : vector<32x1xf32> to vector<32x256xf32>
    %6 = arith.addf %3, %5 : vector<32x256xf32>
    %cst_6 = arith.constant 5.000000e-01 : f32
    %7 = vector.broadcast %cst_6 : f32 to vector<32x256xf32>
    %8 = arith.mulf %7, %6 : vector<32x256xf32>
    %cst_7 = arith.constant 0.707106769 : f32
    %9 = vector.broadcast %cst_7 : f32 to vector<32x256xf32>
    %10 = arith.mulf %6, %9 : vector<32x256xf32>
    %11 = math.erf %10 : vector<32x256xf32>
    %cst_8 = arith.constant 1.000000e+00 : f32
    %12 = vector.broadcast %cst_8 : f32 to vector<32x256xf32>
    %13 = arith.addf %12, %11 : vector<32x256xf32>
    %14 = arith.mulf %8, %13 : vector<32x256xf32>
    %c0_9 = arith.constant 0 : index
    %c0_10 = arith.constant 0 : index
    %15 = vector.load %arg5[%c0_9, %c0_10] : memref<8x32xbf16, #tpu.memory_space<vmem>>, vector<8x32xbf16>
    %16 = arith.truncf %14 : vector<32x256xf32> to vector<32x256xbf16>
    %cst_11 = arith.constant dense<0.000000e+00> : vector<8x256xf32>
    %17 = tpu.matmul %15, %16, %cst_11 {dimension_numbers = #tpu.dot_dimension_numbers<[1], [0], [0], [1], [0, 0, 1, 1], [], []>} : vector<8x32xbf16>, vector<32x256xbf16>, vector<8x256xf32> -> vector<8x256xf32>
    %c0_12 = arith.constant 0 : index
    %c0_13 = arith.constant 0 : index
    %18 = vector.load %arg6[%c0_12, %c0_13] : memref<8x1xf32, #tpu.memory_space<vmem>>, vector<8x1xf32>
    %19 = vector.broadcast %18 : vector<8x1xf32> to vector<8x256xf32>
    %20 = arith.addf %17, %19 : vector<8x256xf32>
    %c0_14 = arith.constant 0 : index
    %c0_15 = arith.constant 0 : index
    %c0_16 = arith.constant 0 : index
    %21 = vector.load %arg7[%c0_14, %c0_15, %c0_16] : memref<1x8x256xf32, #tpu.memory_space<vmem>>, vector<1x8x256xf32>
    %22 = vector.shape_cast %21 : vector<1x8x256xf32> to vector<8x256xf32>
    %23 = vector.shape_cast %20 : vector<8x256xf32> to vector<1x8x256xf32>
    tpu.vector_store %arg7[%c0_14, %c0_15, %c0_16], %23 {strides = array<i32>} : memref<1x8x256xf32, #tpu.memory_space<vmem>>, vector<1x8x256xf32>,
    return
  }
  func.func @transform_0(%arg0: i32, %arg1: i32) -> (i32, i32, i32) {
    %c0_i32 = arith.constant 0 : i32
    %c0_i32_0 = arith.constant 0 : i32
    return %arg0, %c0_i32, %arg1 : i32, i32, i32
  }
  func.func @transform_1(%arg0: i32, %arg1: i32) -> (i32, i32) {
    %c0_i32 = arith.constant 0 : i32
    %c0_i32_0 = arith.constant 0 : i32
    %c0_i32_1 = arith.constant 0 : i32
    return %c0_i32, %c0_i32_0 : i32, i32
  }
  func.func @transform_2(%arg0: i32, %arg1: i32) -> (i32, i32) {
    %c0_i32 = arith.constant 0 : i32
    %c0_i32_0 = arith.constant 0 : i32
    %c0_i32_1 = arith.constant 0 : i32
    return %c0_i32, %c0_i32_0 : i32, i32
  }
  func.func @transform_3(%arg0: i32, %arg1: i32) -> (i32, i32) {
    %c0_i32 = arith.constant 0 : i32
    %c0_i32_0 = arith.constant 0 : i32
    %c0_i32_1 = arith.constant 0 : i32
    return %c0_i32, %c0_i32_0 : i32, i32
  }
  func.func @transform_4(%arg0: i32, %arg1: i32) -> (i32, i32) {
    %c0_i32 = arith.constant 0 : i32
    %c0_i32_0 = arith.constant 0 : i32
    %c0_i32_1 = arith.constant 0 : i32
    return %c0_i32, %c0_i32_0 : i32, i32
  }
  func.func @transform_5(%arg0: i32, %arg1: i32) -> (i32, i32, i32) {
    %c0_i32 = arith.constant 0 : i32
    %c0_i32_0 = arith.constant 0 : i32
    return %arg0, %c0_i32, %arg1 : i32, i32, i32
  }
}

</mosaic_0001>

<bundles_post_ra>
// kernel: feed_forward.1
= control target key start
LH: loop header
LB: loop body
LE: loop exit
PB: predicated region body
PF: predicated region fallthrough
CT: control target
= control target key end

     0   :  { %s979_s18 = smov 0   ;;  %s981_s19 = smov 0   ;;  %s1317_s0 = inlined_call_operand.vmem [shape: bf16[2,8,256], index: 0, kind: input, shape index: {}]   ;;  %s1318_s1 = inlined_call_operand.vmem [shape: bf16[32,8], index: 1, kind: input, shape index: {}]   ;;  %s1319_s2 = inlined_call_operand.vmem [shape: f32[32,1], index: 2, kind: input, shape index: {}]   ;;  %s1320_s3 = inlined_call_operand.vmem [shape: bf16[8,32], index: 3, kind: input, shape index: {}]   ;;  %s1321_s4 = inlined_call_operand.vmem [shape: f32[8,1], index: 4, kind: input, shape index: {}]   ;;  %s1322_s5 = inlined_call_operand.vmem [shape: f32[2,8,256], index: 5, kind: output, shape index: {}]  }
   0x1   :  { %s983_s20 = smov 0  }
   0x2 LB: > { %s27_s21 = sadd.s32 1, %s942_s19  ;;  %p847_p0 = scmp.ge.s32.totalorder %s946_s20, 1  ;;  %s946_s20 = sphi %s983_s20, %s15_s20   ;;  %s942_s19 = sphi %s981_s19, %s1332_s19   ;;  %s938_s18 = sphi %s979_s18, %s1331_s18  }
   0x3   : > { %p29_p1 = scmp.ge.s32.totalorder %s27_s21, 2  ;;  %p208_p2 = scmp.lt.s32.totalorder %s946_s20, 3 }
   0x5   : > { %s1334_s21 = smov (%p29_p1, %s27_s21), 0  ;;  %p209_p3 = pnand %p847_p0, %p208_p2 }
   0x6   : > { %p245_p4 = scmp.lt.s32.totalorder (!%p209_p3), %s938_s18, 1 }
   0x7   : > { %212 = sbr.rel (%p209_p3) target bundleno = 409 (0x199), region = 40 }
   0xc   : > { %v270_v0 = vld [vmem:[%s1319_s2] sm:$0xff]  ;;  %v948_v1 = vmov 0   ;;  %v272_v2 = vld [vmem:[%s1319_s2 + $0x10] sm:$0xff]  ;;  %s1336_s18 = smov (!%p245_p4, %s938_s18), 1  ;;  %v271_v6 = vld [vmem:[%s1319_s2 + $0x8] sm:$0xff]  ;;  %vm316_vm0 = vcmask 1043456  }
   0xd   : > { %906 = vset.pattern.permute.xlu1 %v948_v1  ;;  %905 = vset.pattern.permute.xlu0 %v948_v1  ;;  %s876_s26 = sshll.u32 %s1336_s18, 3  ;;  %v273_v7 = vld [vmem:[%s1319_s2 + $0x18] sm:$0xff]  ;;  %v878_v12 = vld [vmem:[%s1318_s1] sm:$0xff]  ;;  %vm309_vm1 = vcmask 64512   ;;  %v879_v13 = vld [vmem:[%s1318_s1 + $0x8] sm:$0xff]  ;;  %s877_s17 = sshll.u32 %s1336_s18, 4 }
   0xe   : > { %276 = vperm.xlu1 %906, %v270_v0   ;;  %286 = vperm.xlu0 %905, %v272_v2   ;;  %s252_s29 = scalar_lea.vmem %s1317_s0, %s876_s26  ;;  %s262_s24 = scalar_lea.vmem %s1322_s5, %s877_s17 }
   0xf   : > { %907 = vset.pattern.permute.xlu2 %v948_v1  ;;  %v265_v3 = vld [vmem:[%s252_s29] sm:$0xff] }
  0x10   : > { %v305_v4 = vunpack.c.l.b16 %v265_v3  ;;  %v306_v5 = vunpack.c.h.b16 %v265_v3 }
  0x12   : > { %v307_v8 = vpack.c.b16 %v305_v4, %v305_v4  ;;  %v308_v9 = vpack.c.b16 %v306_v5, %v306_v5 }
  0x14   : > { %v318_v10 = vsel %vm316_vm0, %v307_v8, 0  ;;  %v321_v11 = vsel %vm316_vm0, %v308_v9, 0 }
  0x15   : > { %330 = vmatpush.bf16.msra.mxu0 %v318_v10  ;;  %349 = vmatpush.bf16.msra.mxu1 %v321_v11 }
  0x16   : > { %281 = vperm.xlu1 %906, %v271_v6   ;;  %291 = vperm.xlu0 %905, %v273_v7  }
  0x18   : > { %860 = vmatmul.msk.bf16.vlgmr.msra.gmra.mxu0 %vm309_vm1, %v878_v12  ;;  %862 = vmatmul.msk.bf16.vlgmr.msra.gmra.mxu1 %vm309_vm1, %v878_v12 }
  0x28   : > { %861 = vmatmul.msk.bf16.gmra.mxu0 %vm309_vm1, %v879_v13  ;;  %863 = vmatmul.msk.bf16.gmra.mxu1 %vm309_vm1, %v879_v13 }
  0x80   : > { %v277_v14 = vpop.permute.xlu1 %276  ;;  %v287_v32 = vpop.permute.xlu0 %286 }
  0x88   : > { %v282_v27 = vpop.permute.xlu1 %281  ;;  %v292_v56 = vpop.permute.xlu0 %291 }
  0x95   : > { %v332_v15 = vpop.f32.mrf.mxu0  ;;  %v351_v16 = vpop.f32.mrf.mxu1 }
  0x96   : > { %v1021_v17 = vadd.f32 %v332_v15, %v277_v14  ;;  %v1023_v18 = vadd.f32 %v351_v16, %v277_v14 }
  0x98   : > { %v1026_v19 = vmul.f32 0.70710677, %v1021_v17  ;;  %v1029_v20 = vmul.f32 0.70710677, %v1023_v18 }
  0x9a   : > { %v377_v21 = vmul.f32 %v1026_v19, %v1026_v19  ;;  %v417_v22 = vmul.f32 %v1029_v20, %v1029_v20 }
  0x9c   : > { %v1035_v23 = vmin.f32 %v377_v21, 16.0  ;;  %v1037_v26 = vmin.f32 %v417_v22, 16.0 }
  0x9d   : > { %v334_v24 = vpop.f32.mrf.mxu0  ;;  %v353_v25 = vpop.f32.mrf.mxu1 }
  0x9e   : > { %v379_v28 = vmul.f32 2.1237322e-06, %v1035_v23  ;;  %v1040_v29 = vadd.f32 %v334_v24, %v282_v27  ;;  %v1042_v30 = vadd.f32 %v353_v25, %v282_v27  ;;  %v419_v31 = vmul.f32 2.1237322e-06, %v1037_v26 }
  0x9f   : > { %v390_v36 = vmul.f32 3.8918573e-05, %v1035_v23 }
  0xa0   : > { %v380_v33 = vadd.f32 0.00028619796, %v379_v28  ;;  %v1051_v39 = vmul.f32 0.70710677, %v1040_v29  ;;  %v1054_v40 = vmul.f32 0.70710677, %v1042_v30 }
  0xa1   : > { %v420_v41 = vadd.f32 0.00028619796, %v419_v31  ;;  %v391_v44 = vadd.f32 0.001143296, %v390_v36 }
  0xa2   : > { %v381_v42 = vmul.f32 %v380_v33, %v1035_v23  ;;  %v457_v46 = vmul.f32 %v1051_v39, %v1051_v39  ;;  %v497_v47 = vmul.f32 %v1054_v40, %v1054_v40 }
  0xa3   : > { %v421_v49 = vmul.f32 %v420_v41, %v1037_v26  ;;  %v392_v55 = vmul.f32 %v391_v44, %v1035_v23 }
  0xa4   : > { %v382_v51 = vadd.f32 0.0036580483, %v381_v42  ;;  %v1077_v58 = vmin.f32 %v457_v46, 16.0  ;;  %v1079_v59 = vmin.f32 %v497_v47, 16.0 }
  0xa5   : > { %v337_v34 = vpop.f32.mrf.mxu0  ;;  %v356_v35 = vpop.f32.mrf.mxu1  ;;  %v422_v62 = vadd.f32 0.0036580483, %v421_v49  ;;  %v393_v3 = vadd.f32 0.014752088, %v392_v55 }
  0xa6   : > { %v1046_v37 = vadd.f32 %v337_v34, %v287_v32  ;;  %v1048_v38 = vadd.f32 %v356_v35, %v287_v32  ;;  %v383_v1 = vmul.f32 %v382_v51, %v1035_v23  ;;  %v459_v5 = vmul.f32 2.1237322e-06, %v1077_v58 }
  0xa7   : > { %v499_v6 = vmul.f32 2.1237322e-06, %v1079_v59  ;;  %v423_v9 = vmul.f32 %v422_v62, %v1037_v26  ;;  %v394_v16 = vmul.f32 %v393_v3, %v1035_v23 }
  0xa8   : > { %v1058_v43 = vmul.f32 0.70710677, %v1046_v37  ;;  %v1061_v45 = vmul.f32 0.70710677, %v1048_v38  ;;  %v384_v13 = vadd.f32 0.05243302, %v383_v1 }
  0xa9   : > { %v460_v27 = vadd.f32 0.00028619796, %v459_v5  ;;  %v500_v28 = vadd.f32 0.00028619796, %v499_v6  ;;  %v1114_v42 = vadd.f32 0.05243302, %v423_v9 }
  0xaa   : > { %v537_v48 = vmul.f32 %v1058_v43, %v1058_v43  ;;  %v577_v50 = vmul.f32 %v1061_v45, %v1061_v45  ;;  %v385_v41 = vmul.f32 %v384_v13, %v1035_v23 }
  0xab   : > { %v461_v49 = vmul.f32 %v460_v27, %v1077_v58 }
  0xac   : > { %v1072_v52 = vmin.f32 %v537_v48, 16.0  ;;  %v1075_v57 = vmin.f32 %v577_v50, 16.0  ;;  %v386_v62 = vadd.f32 0.18741608, %v385_v41 }
  0xad   : > { %v339_v53 = vpop.f32.mrf.mxu0  ;;  %v358_v54 = vpop.f32.mrf.mxu1 }
  0xae   : > { %v539_v60 = vmul.f32 2.1237322e-06, %v1072_v52  ;;  %v1082_v61 = vadd.f32 %v339_v53, %v292_v56  ;;  %v579_v63 = vmul.f32 2.1237322e-06, %v1075_v57  ;;  %v1085_v0 = vadd.f32 %v358_v54, %v292_v56 }
  0xaf   : > { %v550_v12 = vmul.f32 3.8918573e-05, %v1072_v52  ;;  %v590_v25 = vmul.f32 3.8918573e-05, %v1075_v57  ;;  %v395_v53 = vadd.f32 0.112945676, %v394_v16  ;;  %v501_v54 = vmul.f32 %v500_v28, %v1079_v59 }
  0xb0   : > { %v540_v2 = vadd.f32 0.00028619796, %v539_v60  ;;  %v580_v4 = vadd.f32 0.00028619796, %v579_v63  ;;  %v1092_v8 = vmul.f32 0.70710677, %v1082_v61 }
  0xb1   : > { %v1097_v11 = vmul.f32 0.70710677, %v1085_v0  ;;  %v551_v24 = vadd.f32 0.001143296, %v550_v12  ;;  %v591_v36 = vadd.f32 0.001143296, %v590_v25  ;;  %v396_v25 = vmul.f32 %v395_v53, %v1035_v23 }
  0xb2   : > { %v541_v7 = vmul.f32 %v540_v2, %v1072_v52  ;;  %v581_v10 = vmul.f32 %v580_v4, %v1075_v57  ;;  %v617_v15 = vmul.f32 %v1092_v8, %v1092_v8 }
  0xb3   : > { %v657_v22 = vmul.f32 %v1097_v11, %v1097_v11  ;;  %v552_v35 = vmul.f32 %v551_v24, %v1072_v52  ;;  %v592_v48 = vmul.f32 %v591_v36, %v1075_v57 }
  0xb4   : > { %v542_v14 = vadd.f32 0.0036580483, %v541_v7  ;;  %v582_v21 = vadd.f32 0.0036580483, %v581_v10  ;;  %v1107_v32 = vmin.f32 %v617_v15, 16.0 }
  0xb5   : > { %v1110_v34 = vmin.f32 %v657_v22, 16.0  ;;  %v553_v51 = vadd.f32 0.014752088, %v552_v35  ;;  %v593_v1 = vadd.f32 0.014752088, %v592_v48 }
  0xb6   : > { %v543_v31 = vmul.f32 %v542_v14, %v1072_v52  ;;  %v583_v33 = vmul.f32 %v582_v21, %v1075_v57  ;;  %v619_v46 = vmul.f32 2.1237322e-06, %v1107_v32  ;;  %v630_v60 = vmul.f32 3.8918573e-05, %v1107_v32 }
  0xb7   : > { %v659_v47 = vmul.f32 2.1237322e-06, %v1110_v34  ;;  %v554_v63 = vmul.f32 %v553_v51, %v1072_v52  ;;  %v670_v2 = vmul.f32 3.8918573e-05, %v1110_v34  ;;  %v462_v7 = vadd.f32 0.0036580483, %v461_v49 }
  0xb8   : > { %v544_v44 = vadd.f32 0.05243302, %v543_v31  ;;  %v584_v50 = vadd.f32 0.05243302, %v583_v33  ;;  %v620_v55 = vadd.f32 0.00028619796, %v619_v46  ;;  %v594_v10 = vmul.f32 %v593_v1, %v1075_v57 }
  0xb9   : > { %v660_v56 = vadd.f32 0.00028619796, %v659_v47  ;;  %v631_v6 = vadd.f32 0.001143296, %v630_v60  ;;  %v555_v9 = vadd.f32 0.112945676, %v554_v63  ;;  %v463_v35 = vmul.f32 %v462_v7, %v1077_v58 }
  0xba   : > { %v545_v3 = vmul.f32 %v544_v44, %v1072_v52  ;;  %v621_v4 = vmul.f32 %v620_v55, %v1107_v32  ;;  %v671_v12 = vadd.f32 0.001143296, %v670_v2  ;;  %v585_v13 = vmul.f32 %v584_v50, %v1075_v57 }
  0xbb   : > { %v661_v5 = vmul.f32 %v660_v56, %v1110_v34  ;;  %v632_v16 = vmul.f32 %v631_v6, %v1107_v32  ;;  %v556_v21 = vmul.f32 %v555_v9, %v1072_v52  ;;  %v595_v22 = vadd.f32 0.112945676, %v594_v10 }
  0xbc   : > { %v622_v14 = vadd.f32 0.0036580483, %v621_v4  ;;  %v672_v24 = vmul.f32 %v671_v12, %v1110_v34  ;;  %v546_v27 = vadd.f32 0.18741608, %v545_v3  ;;  %v586_v46 = vadd.f32 0.18741608, %v585_v13 }
  0xbd   : > { %v662_v15 = vadd.f32 0.0036580483, %v661_v5  ;;  %v633_v33 = vadd.f32 0.014752088, %v632_v16  ;;  %v557_v36 = vadd.f32 0.4994258, %v556_v21  ;;  %v596_v41 = vmul.f32 %v595_v22, %v1075_v57 }
  0xbe   : > { %v623_v28 = vmul.f32 %v622_v14, %v1107_v32  ;;  %v673_v44 = vadd.f32 0.014752088, %v672_v24  ;;  %v397_v55 = vadd.f32 0.4994258, %v396_v25  ;;  %v547_v56 = vmul.f32 %v546_v27, %v1072_v52 }
  0xbf   : > { %v663_v31 = vmul.f32 %v662_v15, %v1110_v34  ;;  %v634_v49 = vmul.f32 %v633_v33, %v1107_v32  ;;  %v558_v50 = vmul.f32 %v557_v36, %v1072_v52  ;;  %v597_v51 = vadd.f32 0.4994258, %v596_v41 }
  0xc0   : > { %v624_v47 = vadd.f32 0.05243302, %v623_v28  ;;  %v674_v53 = vmul.f32 %v673_v44, %v1110_v34  ;;  %v398_v5 = vmul.f32 %v397_v55, %v1035_v23  ;;  %v1148_v6 = vmul.f32 0.5, %v1046_v37 }
  0xc1   : > { %v664_v48 = vadd.f32 0.05243302, %v663_v31  ;;  %v635_v1 = vadd.f32 0.112945676, %v634_v49  ;;  %v1143_v2 = vadd.f32 1.0, %v558_v50  ;;  %v598_v3 = vmul.f32 %v597_v51, %v1075_v57 }
  0xc2   : > { %v625_v60 = vmul.f32 %v624_v47, %v1107_v32  ;;  %v675_v4 = vadd.f32 0.112945676, %v674_v53  ;;  %v587_v7 = vmul.f32 %v586_v46, %v1075_v57  ;;  %v470_v52 = vmul.f32 3.8918573e-05, %v1077_v58 }
  0xc3   : > { %v665_v63 = vmul.f32 %v664_v48, %v1110_v34  ;;  %v636_v9 = vmul.f32 %v635_v1, %v1107_v32  ;;  %v502_v10 = vadd.f32 0.0036580483, %v501_v54  ;;  %908 = vrcp.f32 %v1143_v2 }
  0xc4   : > { %v626_v12 = vadd.f32 0.18741608, %v625_v60  ;;  %v464_v14 = vadd.f32 0.05243302, %v463_v35  ;;  %v1155_v15 = vmul.f32 0.5, %v1048_v38  ;;  %v1157_v21 = vadd.f32 1.0, %v598_v3 }
  0xc5   : > { %v666_v13 = vadd.f32 0.18741608, %v665_v63  ;;  %v637_v16 = vadd.f32 0.4994258, %v636_v9  ;;  %v1160_v37 = vmul.f32 %v386_v62, %v1035_v23  ;;  %v548_v57 = vadd.f32 1.1283791, %v547_v56 }
  0xc6   : > { %v676_v22 = vmul.f32 %v675_v4, %v1110_v34  ;;  %v1163_v24 = vadd.f32 1.0, %v398_v5  ;;  %v588_v54 = vadd.f32 1.1283791, %v587_v7  ;;  %910 = vrcp.f32 %v1157_v21 }
  0xc7   : > { %v638_v25 = vmul.f32 %v637_v16, %v1107_v32  ;;  %v471_v27 = vadd.f32 0.001143296, %v470_v52  ;;  %v1168_v38 = vmul.f32 %v502_v10, %v1079_v59  ;;  %v627_v28 = vmul.f32 %v626_v12, %v1107_v32 }
  0xc8   : > { %v667_v31 = vmul.f32 %v666_v13, %v1110_v34  ;;  %v677_v23 = vadd.f32 0.4994258, %v676_v22  ;;  %v1173_v62 = vmul.f32 %v464_v14, %v1077_v58  ;;  %v1176_v33 = vmul.f32 0.5, %v1082_v61 }
  0xc9   : > { %v569_v35 = vand.u32 2147483647, %v1143_v2  ;;  %v1179_v36 = vadd.f32 1.0, %v638_v25  ;;  %v909_v41 = vpop.eup %908  ;;  %v549_v44 = vmul.f32 %v548_v57, %v1058_v43  ;;  %v571_v46 = vand.u32 2147483648, %v1143_v2 }
  0xca   : > { %v678_v32 = vmul.f32 %v677_v23, %v1110_v34  ;;  %912 = vrcp.f32 %v1163_v24  ;;  %v1186_v47 = vmul.f32 %v588_v54, %v1061_v45  ;;  %v561_v48 = vmul.f32 %v909_v41, %v1143_v2 }
  0xcb   : > { %914 = vrcp.f32 %v1179_v36  ;;  %v472_v61 = vmul.f32 %v471_v27, %v1077_v58  ;;  %v628_v49 = vadd.f32 1.1283791, %v627_v28  ;;  %v668_v50 = vadd.f32 1.1283791, %v667_v31 }
  0xcc   : > { %vm565_vm2 = vweird.f32 %v1143_v2  ;;  %v1192_v43 = vadd.f32 1.0, %v678_v32  ;;  %v911_v51 = vpop.eup %910  ;;  %v562_v53 = vsub.f32 1.0, %v561_v48  ;;  %vm1194_vm3 = vcmp.eq.f32.partialorder %v569_v35, 8.507059e+37 }
  0xcd   : > { %v609_v45 = vand.u32 2147483647, %v1157_v21  ;;  %v611_v55 = vand.u32 2147483648, %v1157_v21  ;;  %vm566_vm4 = vweird.f32 %v909_v41  ;;  %v572_v56 = vor.u32 1.1754944e-38, %v571_v46 }
  0xce   : > { %v601_v60 = vmul.f32 %v911_v51, %v1157_v21  ;;  %vm605_vm5 = vweird.f32 %v1157_v21  ;;  %v563_v63 = vmul.f32 %v909_v41, %v562_v53  ;;  %916 = vrcp.f32 %v1192_v43  ;;  %vm567_vm8 = vmor %vm565_vm2, %vm566_vm4 }
  0xcf   : > { %v473_v1 = vadd.f32 0.014752088, %v472_v61  ;;  %v430_v3 = vmul.f32 3.8918573e-05, %v1037_v26  ;;  %v629_v5 = vmul.f32 %v628_v49, %v1092_v8  ;;  %v1208_v7 = vmul.f32 %v668_v50, %v1097_v11 }
  0xd0   : > { %v1204_v4 = vpop.eup %912  ;;  %v649_v9 = vand.u32 2147483647, %v1179_v36  ;;  %v602_v52 = vsub.f32 1.0, %v601_v60  ;;  %v564_v12 = vadd.f32 %v909_v41, %v563_v63  ;;  %vm645_vm6 = vweird.f32 %v1179_v36 }
  0xd1   : > { %v915_v10 = vpop.eup %914  ;;  %vm1212_vm7 = vcmp.eq.f32.partialorder %v609_v45, 8.507059e+37  ;;  %v612_v14 = vor.u32 1.1754944e-38, %v611_v55  ;;  %v651_v11 = vand.u32 2147483648, %v1179_v36  ;;  %vm606_vm9 = vweird.f32 %v911_v51 }
  0xd2   : > { %v641_v8 = vmul.f32 %v915_v10, %v1179_v36  ;;  %v603_v16 = vmul.f32 %v911_v51, %v602_v52  ;;  %v568_v57 = vsel %vm567_vm8, %v909_v41, %v564_v12  ;;  %v401_v22 = vmul.f32 %v1204_v4, %v1163_v24  ;;  %vm607_vm11 = vmor %vm605_vm5, %vm606_vm9 }
  0xd3   : > { %v474_v54 = vmul.f32 %v473_v1, %v1077_v58  ;;  %v431_v25 = vadd.f32 0.001143296, %v430_v3  ;;  %v573_v27 = vsel %vm1194_vm3, %v572_v56, %v568_v57  ;;  %vm1226_vm10 = vcmp.eq.f32.partialorder %v649_v9, 8.507059e+37 }
  0xd4   : > { %v642_v28 = vsub.f32 1.0, %v641_v8  ;;  %v604_v31 = vadd.f32 %v911_v51, %v603_v16  ;;  %v917_v23 = vpop.eup %916  ;;  %v574_v35 = vmul.f32 %v573_v27, %v549_v44  ;;  %v510_v32 = vmul.f32 3.8918573e-05, %v1079_v59 }
  0xd5   : > { %v475_v41 = vadd.f32 0.112945676, %v474_v54  ;;  %v432_v46 = vmul.f32 %v431_v25, %v1037_v26  ;;  %vm646_vm12 = vweird.f32 %v915_v10  ;;  %v681_v49 = vmul.f32 %v917_v23, %v1192_v43 }
  0xd6   : > { %v643_v48 = vmul.f32 %v915_v10, %v642_v28  ;;  %v608_v61 = vsel %vm607_vm11, %v911_v51, %v604_v31  ;;  %v652_v50 = vor.u32 1.1754944e-38, %v651_v11  ;;  %v402_v34 = vsub.f32 1.0, %v401_v22  ;;  %vm647_vm13 = vmor %vm645_vm6, %vm646_vm12 }
  0xd7   : > { %v613_v53 = vsel %vm1212_vm7, %v612_v14, %v608_v61  ;;  %v476_v44 = vmul.f32 %v475_v41, %v1077_v58  ;;  %v682_v21 = vsub.f32 1.0, %v681_v49  ;;  %v689_v55 = vand.u32 2147483647, %v1192_v43 }
  0xd8   : > { %v644_v45 = vadd.f32 %v915_v10, %v643_v48  ;;  %v433_v56 = vadd.f32 0.014752088, %v432_v46  ;;  %v868_v60 = vclamps-f32 %v574_v35, 1.0  ;;  %v691_v51 = vand.u32 2147483648, %v1192_v43 }
  0xd9   : > { %v477_v63 = vadd.f32 0.4994258, %v476_v44  ;;  %v511_v1 = vadd.f32 0.001143296, %v510_v32  ;;  %v614_v9 = vmul.f32 %v613_v53, %v1186_v47  ;;  %v683_v52 = vmul.f32 %v917_v23, %v682_v21 }
  0xda   : > { %v648_v3 = vsel %vm647_vm13, %v915_v10, %v644_v45  ;;  %vm686_vm14 = vweird.f32 %v917_v23  ;;  %vm685_vm15 = vweird.f32 %v1192_v43  ;;  %v403_v13 = vmul.f32 %v1204_v4, %v402_v34 }
  0xdb   : > { %v653_v12 = vsel %vm1226_vm10, %v652_v50, %v648_v3  ;;  %v478_v14 = vmul.f32 %v477_v63, %v1077_v58  ;;  %v684_v8 = vadd.f32 %v917_v23, %v683_v52  ;;  %vm690_vm0 = vcmp.eq.f32.partialorder %v689_v55, 8.507059e+37  ;;  %vm687_vm1 = vmor %vm685_vm15, %vm686_vm14 }
  0xdc   : > { %v654_v36 = vmul.f32 %v653_v12, %v629_v5  ;;  %v434_v11 = vmul.f32 %v433_v56, %v1037_v26  ;;  %v701_v16 = vadd.f32 1.0, %v868_v60  ;;  %v692_v10 = vor.u32 1.1754944e-38, %v691_v51 }
  0xdd   : > { %v1249_v47 = vadd.f32 1.0, %v478_v14  ;;  %v512_v57 = vmul.f32 %v511_v1, %v1079_v59  ;;  %v869_v54 = vclamps-f32 %v614_v9, 1.0  ;;  %v688_v25 = vsel %vm687_vm1, %v917_v23, %v684_v8 }
  0xde   : > { %v870_v22 = vclamps-f32 %v654_v36, 1.0  ;;  %v435_v43 = vadd.f32 0.112945676, %v434_v11  ;;  %v693_v27 = vsel %vm690_vm0, %v692_v10, %v688_v25  ;;  %v404_v28 = vadd.f32 %v1204_v4, %v403_v13  ;;  %v718_v25 = vld [vmem:[%s1321_s4] sm:$0xff] }
  0xdf   : > { %vm406_vm2 = vweird.f32 %v1204_v4  ;;  %918 = vrcp.f32 %v1249_v47  ;;  %v466_v5 = vadd.f32 0.18741608, %v1173_v62  ;;  %v694_v31 = vmul.f32 %v693_v27, %v1208_v7  ;;  %721 = vperm.xlu2 %907, %v718_v25  }
  0xe0   : > { %v703_v2 = vadd.f32 1.0, %v870_v22  ;;  %v411_v35 = vand.u32 2147483648, %v1163_v24  ;;  %vm405_vm3 = vweird.f32 %v1163_v24  ;;  %v409_v41 = vand.u32 2147483647, %v1163_v24 }
  0xe1   : > { %v436_v23 = vmul.f32 %v435_v43, %v1037_v26  ;;  %v513_v46 = vadd.f32 0.014752088, %v512_v57  ;;  %v709_v32 = vmul.f32 %v701_v16, %v1148_v6  ;;  %v871_v61 = vclamps-f32 %v694_v31, 1.0  ;;  %vm1263_vm4 = vmor %vm405_vm3, %vm406_vm2 }
  0xe2   : > { %v711_v48 = vmul.f32 %v703_v2, %v1176_v33  ;;  %v702_v49 = vadd.f32 1.0, %v869_v54  ;;  %v388_v7 = vadd.f32 1.1283791, %v1160_v37  ;;  %v408_v50 = vsel %vm1263_vm4, %v1204_v4, %v404_v28 }
  0xe3   : > { %v437_v24 = vadd.f32 0.4994258, %v436_v23  ;;  %v514_v53 = vmul.f32 %v513_v46, %v1079_v59  ;;  %v368_v34 = vmul.f32 0.5, %v1085_v0  ;;  %v704_v44 = vadd.f32 1.0, %v871_v61 }
  0xe4   : > { %v716_v6 = vpack.c.bf16 %v711_v48, %v709_v32  ;;  %v412_v33 = vor.u32 1.1754944e-38, %v411_v35  ;;  %v467_v21 = vmul.f32 %v466_v5, %v1077_v58  ;;  %vm410_vm5 = vcmp.eq.f32.partialorder %v409_v41, 8.507059e+37 }
  0xe5   : > { %v919_v45 = vpop.eup %918  ;;  %v438_v55 = vmul.f32 %v437_v24, %v1037_v26  ;;  %v515_v56 = vadd.f32 0.112945676, %v514_v53  ;;  %v710_v37 = vmul.f32 %v702_v49, %v1155_v15  ;;  %v712_v60 = vmul.f32 %v704_v44, %v368_v34 }
  0xe6   : > { %734 = vmatpush.bf16.msra.mxu2 %v716_v6  ;;  %v413_v4 = vsel %vm410_vm5, %v412_v33, %v408_v50  ;;  %v481_v51 = vmul.f32 %v919_v45, %v1249_v47  ;;  %v389_v63 = vmul.f32 %v388_v7, %v1026_v19  ;;  %v425_v3 = vmul.f32 %v1114_v42, %v1037_v26 }
  0xe7   : > { %v439_v0 = vadd.f32 1.0, %v438_v55  ;;  %v516_v1 = vmul.f32 %v515_v56, %v1079_v59  ;;  %v504_v58 = vadd.f32 0.05243302, %v1168_v38  ;;  %v717_v9 = vpack.c.bf16 %v712_v60, %v710_v37 }
  0xe8   : > { %v482_v52 = vsub.f32 1.0, %v481_v51  ;;  %v468_v12 = vadd.f32 1.1283791, %v467_v21  ;;  %v414_v13 = vmul.f32 %v413_v4, %v389_v63  ;;  %v491_v15 = vand.u32 2147483648, %v1249_v47 }
  0xe9   : > { %920 = vrcp.f32 %v439_v0  ;;  %747 = vmatpush.bf16.msra.mxu3 %v717_v9  ;;  %vm486_vm6 = vweird.f32 %v919_v45  ;;  %v489_v19 = vand.u32 2147483647, %v1249_v47  ;;  %v517_v36 = vadd.f32 0.4994258, %v516_v1 }
  0xea   : > { %v483_v14 = vmul.f32 %v919_v45, %v482_v52  ;;  %vm485_vm7 = vweird.f32 %v1249_v47  ;;  %v426_v11 = vadd.f32 0.18741608, %v425_v3  ;;  %v469_v38 = vmul.f32 %v468_v12, %v1051_v39 }
  0xeb   : > { %v518_v42 = vmul.f32 %v517_v36, %v1079_v59  ;;  %v505_v16 = vmul.f32 %v504_v58, %v1079_v59  ;;  %vm487_vm8 = vmor %vm485_vm7, %vm486_vm6  ;;  %v492_v10 = vor.u32 1.1754944e-38, %v491_v15  ;;  %v864_v57 = vclamps-f32 %v414_v13, 1.0 }
  0xec   : > { %v484_v8 = vadd.f32 %v919_v45, %v483_v14  ;;  %vm490_vm9 = vcmp.eq.f32.partialorder %v489_v19, 8.507059e+37  ;;  %v427_v39 = vmul.f32 %v426_v11, %v1037_v26  ;;  %v361_v41 = vmul.f32 0.5, %v1021_v17 }
  0xed   : > { %v519_v54 = vadd.f32 1.0, %v518_v42  ;;  %v506_v5 = vadd.f32 0.18741608, %v505_v16  ;;  %v697_v31 = vadd.f32 1.0, %v864_v57  ;;  %v363_v23 = vmul.f32 0.5, %v1040_v29 }
  0xee   : > { %v488_v22 = vsel %vm487_vm8, %v919_v45, %v484_v8  ;;  %v451_v46 = vand.u32 2147483648, %v439_v0  ;;  %v449_v61 = vand.u32 2147483647, %v439_v0  ;;  %v428_v49 = vadd.f32 1.1283791, %v427_v39 }
  0xef   : > { %v921_v43 = vpop.eup %920  ;;  %v493_v27 = vsel %vm490_vm9, %v492_v10, %v488_v22  ;;  %922 = vrcp.f32 %v519_v54  ;;  %v507_v62 = vmul.f32 %v506_v5, %v1079_v59  ;;  %v705_v50 = vmul.f32 %v697_v31, %v361_v41  ;;  %v713_v59 = vld [vmem:[%s1320_s3] sm:$0xf] }
  0xf0   : > { %v494_v47 = vmul.f32 %v493_v27, %v469_v38  ;;  %v441_v28 = vmul.f32 %v921_v43, %v439_v0  ;;  %vm446_vm10 = vweird.f32 %v921_v43  ;;  %vm445_vm11 = vweird.f32 %v439_v0 }
  0xf1   : > { %vm447_vm12 = vmor %vm445_vm11, %vm446_vm10  ;;  %v452_v53 = vor.u32 1.1754944e-38, %v451_v46  ;;  %vm450_vm13 = vcmp.eq.f32.partialorder %v449_v61, 8.507059e+37  ;;  %v429_v29 = vmul.f32 %v428_v49, %v1029_v20  ;;  %v508_v45 = vadd.f32 1.1283791, %v507_v62 }
  0xf2   : > { %v866_v2 = vclamps-f32 %v494_v47, 1.0  ;;  %v442_v35 = vsub.f32 1.0, %v441_v28  ;;  %v531_v21 = vand.u32 2147483648, %v519_v54  ;;  %vm724_vm14 = vcmask 261120  }
  0xf3   : > { %v529_v37 = vand.u32 2147483647, %v519_v54  ;;  %vm525_vm0 = vweird.f32 %v519_v54  ;;  %v509_v4 = vmul.f32 %v508_v45, %v1054_v40  ;;  %v362_v9 = vmul.f32 0.5, %v1023_v18 }
  0xf4   : > { %v699_v32 = vadd.f32 1.0, %v866_v2  ;;  %v443_v48 = vmul.f32 %v921_v43, %v442_v35  ;;  %v532_v20 = vor.u32 1.1754944e-38, %v531_v21  ;;  %v364_v52 = vmul.f32 0.5, %v1042_v30 }
  0xf5   : > { %v923_v7 = vpop.eup %922  ;;  %vm530_vm2 = vcmp.eq.f32.partialorder %v529_v37, 8.507059e+37 }
  0xf6   : > { %v707_v24 = vmul.f32 %v699_v32, %v363_v23  ;;  %v444_v26 = vadd.f32 %v921_v43, %v443_v48  ;;  %v521_v34 = vmul.f32 %v923_v7, %v519_v54  ;;  %vm526_vm15 = vweird.f32 %v923_v7 }
  0xf7   : > { %vm527_vm1 = vmor %vm525_vm0, %vm526_vm15 }
  0xf8   : > { %v714_v6 = vpack.c.bf16 %v707_v24, %v705_v50  ;;  %v448_v17 = vsel %vm447_vm12, %v921_v43, %v444_v26  ;;  %v522_v33 = vsub.f32 1.0, %v521_v34 }
  0xf9   : > { %v453_v44 = vsel %vm450_vm13, %v452_v53, %v448_v17 }
  0xfa   : > { %735 = vmatpush.bf16.msra.mxu2 %v714_v6  ;;  %v454_v55 = vmul.f32 %v453_v44, %v429_v29  ;;  %v523_v56 = vmul.f32 %v923_v7, %v522_v33 }
  0xfc   : > { %v524_v60 = vadd.f32 %v923_v7, %v523_v56  ;;  %v865_v51 = vclamps-f32 %v454_v55, 1.0 }
  0xfd   : > { %872 = vmatmul.msk.bf16.vlgmr.msra.gmra.mxu2 %vm724_vm14, %v713_v59 }
  0xfe   : > { %v528_v63 = vsel %vm527_vm1, %v923_v7, %v524_v60  ;;  %v698_v58 = vadd.f32 1.0, %v865_v51 }
  0xff   : > { %v533_v0 = vsel %vm530_vm2, %v532_v20, %v528_v63 }
 0x100   : > { %v534_v1 = vmul.f32 %v533_v0, %v509_v4  ;;  %v706_v13 = vmul.f32 %v698_v58, %v362_v9 }
 0x102   : > { %v867_v3 = vclamps-f32 %v534_v1, 1.0 }
 0x104   : > { %v700_v12 = vadd.f32 1.0, %v867_v3 }
 0x106   : > { %v708_v15 = vmul.f32 %v700_v12, %v364_v52 }
 0x108   : > { %v715_v14 = vpack.c.bf16 %v708_v15, %v706_v13 }
 0x10a   : > { %748 = vmatpush.bf16.msra.mxu3 %v715_v14 }
 0x10d   : > { %873 = vmatmul.msk.bf16.vlgmr.msra.gmra.mxu3 %vm724_vm14, %v713_v59 }
 0x139   : > { %v722_v40 = vpop.permute.xlu2 %721 }
 0x180   : > { %v737_v19 = vpop.f32.mrf.mxu2 }
 0x181   : > { %v738_v36 = vadd.f32 %v737_v19, %v722_v40 }
 0x183   : > { %754 = vst [vmem:[%s262_s24] sm:$0xff] %v738_v36 }
 0x188   : > { %v739_v8 = vpop.f32.mrf.mxu2 }
 0x190   : > { %v750_v18 = vpop.f32.mrf.mxu3 }
 0x191   : > { %v751_v42 = vadd.f32 %v750_v18, %v722_v40 }
 0x193   : > { %755 = vst [vmem:[%s262_s24 + $0x8] sm:$0xff] %v751_v42 }
 0x198   : > { %v752_v30 = vpop.f32.mrf.mxu3 }
 0x199 PF: > { %s15_s20 = sadd.s32 1, %s946_s20   ;;  %s1331_s18 = smov %s942_s19 }
 0x19a   : > { %p12_p5 = scmp.ge.s32.totalorder %s15_s20, 4   ;;  %s1332_s19 = smov %s1334_s21 }
 0x19c   :  { %14 = sbr.rel (!%p12_p5) target bundleno = 2 (0x2), region = 70 }

</bundles_post_ra>
